<compile_context>
chip_gen: v6e
topology: v6e:2x2x1
jax: 0.10.0
libtpu: 0.0.40
codegen_flags: <defaults>
</compile_context>

<pallas_src>
import functools

import jax
import jax.numpy as jnp
from jax.experimental import pallas as pl
from jax.experimental.pallas import tpu as pltpu


def _cnn_liu_kernel(x_ref, w_ref, b_ref, o_ref, *, K, Cin, Cout, Lp):
    """One batch tile.

    x_ref: (2, Cin, B, Lh)  even/odd split of the length axis (lanes = Lh):
                            x_ref[p, c, b, j] = x[b, c, 2*j + p]
    w_ref: (Cout*Cin*K,)    conv weight, row-major flattened, SMEM scalars
    b_ref: (Cout,)          conv bias, SMEM scalars
    o_ref: (B, Cout, Lp)    relu(maxpool2(conv1d(x))), NCL layout (lanes = Lp)
    """
    # Load each (B, Lh) input plane once; lanes = length axis.
    planes = [[x_ref[p, c] for c in range(Cin)] for p in range(2)]

    # Distinct lane-shifted views, built once and reused by all taps/channels.
    views = {}

    def view(p, c, m):
        key = (p, c, m)
        if key not in views:
            views[key] = planes[p][c][:, m:m + Lp]
        return views[key]

    def tree_sum(terms):
        while len(terms) > 1:
            nxt = [terms[i] + terms[i + 1] for i in range(0, len(terms) - 1, 2)]
            if len(terms) % 2:
                nxt.append(terms[-1])
            terms = nxt
        return terms[0]

    for co in range(Cout):
        even_terms = []   # conv output at positions 2j
        odd_terms = []    # conv output at positions 2j + 1
        for c in range(Cin):
            for k in range(K):
                w = w_ref[(co * Cin + c) * K + k]   # SMEM scalar -> VPU broadcast
                m = k // 2
                if k % 2 == 0:
                    even_terms.append(w * view(0, c, m))
                    odd_terms.append(w * view(1, c, m))
                else:
                    even_terms.append(w * view(1, c, m))
                    odd_terms.append(w * view(0, c, m + 1))
        pooled = jnp.maximum(tree_sum(even_terms), tree_sum(odd_terms)) + b_ref[co]
        o_ref[:, co, :] = jnp.maximum(pooled, 0.0).astype(o_ref.dtype)


def _plan_tiling(N, Lh, Lp, Cin, Cout, batch_tile=None):
    """Pick (batch_tile, n_steps, vmem_limit_bytes) from PADDED tile sizes."""
    rup = lambda v, m: -(-v // m) * m

    try:
        vmem_cap = int(pltpu.get_tpu_info().vmem_capacity_bytes)
    except Exception:  # pragma: no cover - conservative fallback (v7x-sized)
        vmem_cap = 64 << 20
    # v5e/v6e (128 MiB) -> ~96 MiB scoped; v7x (64 MiB) -> ~48 MiB scoped.
    vmem_limit = max(32 << 20, min(vmem_cap * 3 // 4, 112 << 20))
    budget = vmem_limit // 2   # headroom for compiler temporaries / spills

    lh_pad = rup(max(Lh, 1), 128)
    lp_pad = rup(max(Lp, 1), 128)
    cout_pad = rup(Cout, 8)

    def padded_bytes(bt):
        bt8 = rup(bt, 8)
        in_blk = 2 * Cin * bt8 * lh_pad * 4           # (2, Cin, bt, Lh) block
        out_blk = bt8 * cout_pad * lp_pad * 4          # (bt, Cout, Lp) block
        work = (2 * Cin + 6 * Cin + 4) * bt8 * lp_pad * 4   # planes + views + temps
        return 2 * (in_blk + out_blk) + work           # x2: double-buffered blocks

    if batch_tile is not None:
        bt = max(1, min(int(batch_tile), N))
        if bt < N:                               # multi-step blocks stay 8-aligned
            bt = min(rup(bt, 8), rup(N, 8))
    else:
        cap = min(rup(N, 8), 2048)
        bt = min(8, cap)
        while bt * 2 <= cap and padded_bytes(bt * 2) <= budget:
            bt *= 2
        if padded_bytes(cap) <= budget:
            bt = cap
        if bt >= N:
            # Whole batch fits: keep >=2 steps when there is enough work so the
            # pipeline overlaps DMA/compute and v7x's 2 TCs both get a share.
            bt = N if N < 16 else min(rup(-(-N // 2), 8), rup(N, 8))
        n_steps = -(-N // bt)
        if n_steps > 1 and n_steps % 2:          # prefer an even step count (v7x)
            bt2 = rup(-(-N // (n_steps + 1)), 8)
            if bt2 >= 8 and padded_bytes(bt2) <= budget and (-(-N // bt2)) % 2 == 0:
                bt = bt2

    bt = max(1, min(bt, rup(N, 8)))
    n_steps = -(-N // bt)
    return bt, n_steps, vmem_limit


def cnn_liu_forward(x, weight, bias, *, batch_tile=None):
    """Forward pass matching torch cnn_liu: relu(maxpool2(conv1d(x.float()))).

    x:      (N, Cin, L)    PyTorch NCL layout
    weight: (Cout, Cin, K)
    bias:   (Cout,)
    returns (N, Cout, (L - K + 1) // 2) float32   (PyTorch NCL layout)
    """
    x = x.astype(jnp.float32)                       # x = x.float()
    N, Cin, L = x.shape
    Cout, _, K = weight.shape
    Lconv = L - K + 1                               # valid conv, stride 1
    Lp = Lconv // 2                                 # maxpool k=2, s=2
    if Lp <= 0:
        return jnp.zeros((N, Cout, max(Lp, 0)), jnp.float32)

    # ---- layout prep in plain JAX: even/odd split with the length axis last ----
    Lh = (L + 1) // 2
    assert K // 2 + Lp <= Lh, (K, L, Lh, Lp)
    if L % 2:
        x = jnp.pad(x, ((0, 0), (0, 0), (0, 1)))    # pad value never read by kept outputs
    # (N, Cin, 2*Lh) -> (2, Cin, N, Lh) ; [p, c, n, j] = x[n, c, 2*j + p]
    x_eo = jnp.transpose(x.reshape(N, Cin, Lh, 2), (3, 1, 0, 2))

    w_flat = weight.astype(jnp.float32).reshape(-1)   # (Cout*Cin*K,) -> SMEM
    b_flat = bias.astype(jnp.float32).reshape(-1)     # (Cout,)       -> SMEM

    # ---- batch tiling (padded-footprint, generation-aware) ----
    bt, n_steps, vmem_limit = _plan_tiling(N, Lh, Lp, Cin, Cout, batch_tile)
    Npad = n_steps * bt
    if Npad != N:
        x_eo = jnp.pad(x_eo, ((0, 0), (0, 0), (0, Npad - N), (0, 0)))

    kernel = functools.partial(_cnn_liu_kernel, K=K, Cin=Cin, Cout=Cout, Lp=Lp)

    out = pl.pallas_call(
        kernel,
        out_shape=jax.ShapeDtypeStruct((Npad, Cout, Lp), jnp.float32),
        grid_spec=pltpu.PrefetchScalarGridSpec(
            num_scalar_prefetch=0,
            grid=(n_steps,),                         # one program per batch tile
            in_specs=[
                pl.BlockSpec((2, Cin, bt, Lh), lambda n: (0, 0, n, 0)),
                pl.BlockSpec(memory_space=pltpu.MemorySpace.SMEM),   # weights (scalars)
                pl.BlockSpec(memory_space=pltpu.MemorySpace.SMEM),   # bias    (scalars)
            ],
            out_specs=pl.BlockSpec((bt, Cout, Lp), lambda n: (n, 0, 0)),
        ),
        compiler_params=pltpu.CompilerParams(
            dimension_semantics=("parallel",),
            vmem_limit_bytes=int(vmem_limit),
        ),
    )(x_eo, w_flat, b_flat)

    return out[:N]                                   # already (N, Cout, Lp) == NCL


if __name__ == "__main__":
    key = jax.random.PRNGKey(0)
    kx1, kx2, kw, kb = jax.random.split(key, 4)

    # cnn_liu defaults: in=hidden=out=2, kernel=5
    Cin, Cout, K = 2, 2, 5

    # deterministic param init (PyTorch Conv1d default: U(-1/sqrt(fan_in), +))
    fan_in = Cin * K
    bound = 1.0 / (fan_in ** 0.5)
    weight = jax.random.uniform(kw, (Cout, Cin, K), minval=-bound, maxval=bound,
                                dtype=jnp.float32)
    bias = jax.random.uniform(kb, (Cout,), minval=-bound, maxval=bound,
                              dtype=jnp.float32)

    def reference(x):
        x = x.astype(jnp.float32)
        conv = jax.lax.conv_general_dilated(
            x, weight, window_strides=(1,), padding="VALID",
            dimension_numbers=("NCH", "OIH", "NCH"),
            precision=jax.lax.Precision.HIGHEST)
        conv = conv + bias[None, :, None]
        Lp = conv.shape[-1] // 2
        pooled = jnp.maximum(conv[..., 0:2 * Lp:2], conv[..., 1:2 * Lp:2])
        return jnp.maximum(pooled, 0.0)

    # case 1: small default-ish shapes, single grid step
    x1 = jax.random.normal(kx1, (2, Cin, 16), dtype=jnp.float32)
    out1 = jax.block_until_ready(cnn_liu_forward(x1, weight, bias))
    ref1 = reference(x1)
    assert out1.shape == ref1.shape, (out1.shape, ref1.shape)
    assert jnp.allclose(out1, ref1, atol=1e-5, rtol=1e-5)

    # case 2: odd length + batch not divisible by the tile -> multi-step grid + batch padding
    x2 = jax.random.normal(kx2, (20, Cin, 17), dtype=jnp.float32)
    out2 = jax.block_until_ready(cnn_liu_forward(x2, weight, bias, batch_tile=8))
    ref2 = reference(x2)
    assert out2.shape == ref2.shape, (out2.shape, ref2.shape)
    assert jnp.allclose(out2, ref2, atol=1e-5, rtol=1e-5)

    # case 3: larger auto-tiled batch (exercises _plan_tiling's auto path)
    x3 = jax.random.normal(kx1, (33, Cin, 64), dtype=jnp.float32)
    out3 = jax.block_until_ready(cnn_liu_forward(x3, weight, bias))
    ref3 = reference(x3)
    assert out3.shape == ref3.shape, (out3.shape, ref3.shape)
    assert jnp.allclose(out3, ref3, atol=1e-5, rtol=1e-5)

    print("KERNEL_OK")
</pallas_src>

<mosaic_0001>
module attributes {stable_mosaic.version = 11 : i64} {
  func.func @_cnn_liu_kernel(%arg0: i32, %arg1: memref<2x2x2x8xf32, #tpu.memory_space<vmem>>, %arg2: memref<20xf32, #tpu.memory_space<smem>>, %arg3: memref<2xf32, #tpu.memory_space<smem>>, %arg4: memref<2x2x6xf32, #tpu.memory_space<vmem>>) attributes {dimension_semantics = [#tpu.dimension_semantics<parallel>], iteration_bounds = array<i64: 1>, scalar_prefetch = 0 : i64, scratch_operands = 0 : i64, tpu.core_type = #tpu.core_type<tc>, window_params = [{transform_indices = @transform_0, window_bounds = array<i64: 2, 2, 2, 8>}, {transform_indices = @transform_1, window_bounds = array<i64: 20>}, {transform_indices = @transform_2, window_bounds = array<i64: 2>}, {transform_indices = @transform_3, window_bounds = array<i64: 2, 2, 6>}]} {
    %c0 = arith.constant 0 : index
    %c0_0 = arith.constant 0 : index
    %c0_1 = arith.constant 0 : index
    %c0_2 = arith.constant 0 : index
    %0 = vector.load %arg1[%c0, %c0_0, %c0_1, %c0_2] : memref<2x2x2x8xf32, #tpu.memory_space<vmem>>, vector<1x1x2x8xf32>
    %1 = vector.shape_cast %0 : vector<1x1x2x8xf32> to vector<2x8xf32>
    %c0_3 = arith.constant 0 : index
    %c1 = arith.constant 1 : index
    %c0_4 = arith.constant 0 : index
    %c0_5 = arith.constant 0 : index
    %2 = vector.load %arg1[%c0_3, %c1, %c0_4, %c0_5] : memref<2x2x2x8xf32, #tpu.memory_space<vmem>>, vector<1x1x2x8xf32>
    %3 = vector.shape_cast %2 : vector<1x1x2x8xf32> to vector<2x8xf32>
    %c1_6 = arith.constant 1 : index
    %c0_7 = arith.constant 0 : index
    %c0_8 = arith.constant 0 : index
    %c0_9 = arith.constant 0 : index
    %4 = vector.load %arg1[%c1_6, %c0_7, %c0_8, %c0_9] : memref<2x2x2x8xf32, #tpu.memory_space<vmem>>, vector<1x1x2x8xf32>
    %5 = vector.shape_cast %4 : vector<1x1x2x8xf32> to vector<2x8xf32>
    %c1_10 = arith.constant 1 : index
    %c1_11 = arith.constant 1 : index
    %c0_12 = arith.constant 0 : index
    %c0_13 = arith.constant 0 : index
    %6 = vector.load %arg1[%c1_10, %c1_11, %c0_12, %c0_13] : memref<2x2x2x8xf32, #tpu.memory_space<vmem>>, vector<1x1x2x8xf32>
    %7 = vector.shape_cast %6 : vector<1x1x2x8xf32> to vector<2x8xf32>
    %c0_14 = arith.constant 0 : index
    %8 = memref.load %arg2[%c0_14] : memref<20xf32, #tpu.memory_space<smem>>
    %9 = vector.extract_strided_slice %1 {offsets = [0, 0], sizes = [2, 6], strides = [1, 1]} : vector<2x8xf32> to vector<2x6xf32>
    %10 = vector.broadcast %8 : f32 to vector<2x6xf32>
    %11 = arith.mulf %10, %9 : vector<2x6xf32>
    %12 = vector.extract_strided_slice %5 {offsets = [0, 0], sizes = [2, 6], strides = [1, 1]} : vector<2x8xf32> to vector<2x6xf32>
    %13 = vector.broadcast %8 : f32 to vector<2x6xf32>
    %14 = arith.mulf %13, %12 : vector<2x6xf32>
    %c1_15 = arith.constant 1 : index
    %15 = memref.load %arg2[%c1_15] : memref<20xf32, #tpu.memory_space<smem>>
    %16 = vector.broadcast %15 : f32 to vector<2x6xf32>
    %17 = arith.mulf %16, %12 : vector<2x6xf32>
    %18 = vector.extract_strided_slice %1 {offsets = [0, 1], sizes = [2, 6], strides = [1, 1]} : vector<2x8xf32> to vector<2x6xf32>
    %19 = vector.broadcast %15 : f32 to vector<2x6xf32>
    %20 = arith.mulf %19, %18 : vector<2x6xf32>
    %c2 = arith.constant 2 : index
    %21 = memref.load %arg2[%c2] : memref<20xf32, #tpu.memory_space<smem>>
    %22 = vector.broadcast %21 : f32 to vector<2x6xf32>
    %23 = arith.mulf %22, %18 : vector<2x6xf32>
    %24 = vector.extract_strided_slice %5 {offsets = [0, 1], sizes = [2, 6], strides = [1, 1]} : vector<2x8xf32> to vector<2x6xf32>
    %25 = vector.broadcast %21 : f32 to vector<2x6xf32>
    %26 = arith.mulf %25, %24 : vector<2x6xf32>
    %c3 = arith.constant 3 : index
    %27 = memref.load %arg2[%c3] : memref<20xf32, #tpu.memory_space<smem>>
    %28 = vector.broadcast %27 : f32 to vector<2x6xf32>
    %29 = arith.mulf %28, %24 : vector<2x6xf32>
    %30 = vector.extract_strided_slice %1 {offsets = [0, 2], sizes = [2, 6], strides = [1, 1]} : vector<2x8xf32> to vector<2x6xf32>
    %31 = vector.broadcast %27 : f32 to vector<2x6xf32>
    %32 = arith.mulf %31, %30 : vector<2x6xf32>
    %c4 = arith.constant 4 : index
    %33 = memref.load %arg2[%c4] : memref<20xf32, #tpu.memory_space<smem>>
    %34 = vector.broadcast %33 : f32 to vector<2x6xf32>
    %35 = arith.mulf %34, %30 : vector<2x6xf32>
    %36 = vector.extract_strided_slice %5 {offsets = [0, 2], sizes = [2, 6], strides = [1, 1]} : vector<2x8xf32> to vector<2x6xf32>
    %37 = vector.broadcast %33 : f32 to vector<2x6xf32>
    %38 = arith.mulf %37, %36 : vector<2x6xf32>
    %c5 = arith.constant 5 : index
    %39 = memref.load %arg2[%c5] : memref<20xf32, #tpu.memory_space<smem>>
    %40 = vector.extract_strided_slice %3 {offsets = [0, 0], sizes = [2, 6], strides = [1, 1]} : vector<2x8xf32> to vector<2x6xf32>
    %41 = vector.broadcast %39 : f32 to vector<2x6xf32>
    %42 = arith.mulf %41, %40 : vector<2x6xf32>
    %43 = vector.extract_strided_slice %7 {offsets = [0, 0], sizes = [2, 6], strides = [1, 1]} : vector<2x8xf32> to vector<2x6xf32>
    %44 = vector.broadcast %39 : f32 to vector<2x6xf32>
    %45 = arith.mulf %44, %43 : vector<2x6xf32>
    %c6 = arith.constant 6 : index
    %46 = memref.load %arg2[%c6] : memref<20xf32, #tpu.memory_space<smem>>
    %47 = vector.broadcast %46 : f32 to vector<2x6xf32>
    %48 = arith.mulf %47, %43 : vector<2x6xf32>
    %49 = vector.extract_strided_slice %3 {offsets = [0, 1], sizes = [2, 6], strides = [1, 1]} : vector<2x8xf32> to vector<2x6xf32>
    %50 = vector.broadcast %46 : f32 to vector<2x6xf32>
    %51 = arith.mulf %50, %49 : vector<2x6xf32>
    %c7 = arith.constant 7 : index
    %52 = memref.load %arg2[%c7] : memref<20xf32, #tpu.memory_space<smem>>
    %53 = vector.broadcast %52 : f32 to vector<2x6xf32>
    %54 = arith.mulf %53, %49 : vector<2x6xf32>
    %55 = vector.extract_strided_slice %7 {offsets = [0, 1], sizes = [2, 6], strides = [1, 1]} : vector<2x8xf32> to vector<2x6xf32>
    %56 = vector.broadcast %52 : f32 to vector<2x6xf32>
    %57 = arith.mulf %56, %55 : vector<2x6xf32>
    %c8 = arith.constant 8 : index
    %58 = memref.load %arg2[%c8] : memref<20xf32, #tpu.memory_space<smem>>
    %59 = vector.broadcast %58 : f32 to vector<2x6xf32>
    %60 = arith.mulf %59, %55 : vector<2x6xf32>
    %61 = vector.extract_strided_slice %3 {offsets = [0, 2], sizes = [2, 6], strides = [1, 1]} : vector<2x8xf32> to vector<2x6xf32>
    %62 = vector.broadcast %58 : f32 to vector<2x6xf32>
    %63 = arith.mulf %62, %61 : vector<2x6xf32>
    %c9 = arith.constant 9 : index
    %64 = memref.load %arg2[%c9] : memref<20xf32, #tpu.memory_space<smem>>
    %65 = vector.broadcast %64 : f32 to vector<2x6xf32>
    %66 = arith.mulf %65, %61 : vector<2x6xf32>
    %67 = vector.extract_strided_slice %7 {offsets = [0, 2], sizes = [2, 6], strides = [1, 1]} : vector<2x8xf32> to vector<2x6xf32>
    %68 = vector.broadcast %64 : f32 to vector<2x6xf32>
    %69 = arith.mulf %68, %67 : vector<2x6xf32>
    %70 = arith.addf %11, %17 : vector<2x6xf32>
    %71 = arith.addf %23, %29 : vector<2x6xf32>
    %72 = arith.addf %35, %42 : vector<2x6xf32>
    %73 = arith.addf %48, %54 : vector<2x6xf32>
    %74 = arith.addf %60, %66 : vector<2x6xf32>
    %75 = arith.addf %70, %71 : vector<2x6xf32>
    %76 = arith.addf %72, %73 : vector<2x6xf32>
    %77 = arith.addf %75, %76 : vector<2x6xf32>
    %78 = arith.addf %77, %74 : vector<2x6xf32>
    %79 = arith.addf %14, %20 : vector<2x6xf32>
    %80 = arith.addf %26, %32 : vector<2x6xf32>
    %81 = arith.addf %38, %45 : vector<2x6xf32>
    %82 = arith.addf %51, %57 : vector<2x6xf32>
    %83 = arith.addf %63, %69 : vector<2x6xf32>
    %84 = arith.addf %79, %80 : vector<2x6xf32>
    %85 = arith.addf %81, %82 : vector<2x6xf32>
    %86 = arith.addf %84, %85 : vector<2x6xf32>
    %87 = arith.addf %86, %83 : vector<2x6xf32>
    %88 = arith.maximumf %78, %87 : vector<2x6xf32>
    %c0_16 = arith.constant 0 : index
    %89 = memref.load %arg3[%c0_16] : memref<2xf32, #tpu.memory_space<smem>>
    %90 = vector.broadcast %89 : f32 to vector<2x6xf32>
    %91 = arith.addf %88, %90 : vector<2x6xf32>
    %cst = arith.constant 0.000000e+00 : f32
    %92 = vector.broadcast %cst : f32 to vector<2x6xf32>
    %93 = arith.maximumf %91, %92 : vector<2x6xf32>
    %c0_17 = arith.constant 0 : index
    %c0_18 = arith.constant 0 : index
    %c0_19 = arith.constant 0 : index
    %94 = vector.load %arg4[%c0_17, %c0_18, %c0_19] : memref<2x2x6xf32, #tpu.memory_space<vmem>>, vector<2x1x6xf32>
    %95 = vector.shape_cast %94 : vector<2x1x6xf32> to vector<2x6xf32>
    %96 = vector.shape_cast %93 : vector<2x6xf32> to vector<2x1x6xf32>
    tpu.vector_store %arg4[%c0_17, %c0_18, %c0_19], %96 {strides = array<i32>} : memref<2x2x6xf32, #tpu.memory_space<vmem>>, vector<2x1x6xf32>,
    %c10 = arith.constant 10 : index
    %97 = memref.load %arg2[%c10] : memref<20xf32, #tpu.memory_space<smem>>
    %98 = vector.broadcast %97 : f32 to vector<2x6xf32>
    %99 = arith.mulf %98, %9 : vector<2x6xf32>
    %100 = vector.broadcast %97 : f32 to vector<2x6xf32>
    %101 = arith.mulf %100, %12 : vector<2x6xf32>
    %c11 = arith.constant 11 : index
    %102 = memref.load %arg2[%c11] : memref<20xf32, #tpu.memory_space<smem>>
    %103 = vector.broadcast %102 : f32 to vector<2x6xf32>
    %104 = arith.mulf %103, %12 : vector<2x6xf32>
    %105 = vector.broadcast %102 : f32 to vector<2x6xf32>
    %106 = arith.mulf %105, %18 : vector<2x6xf32>
    %c12 = arith.constant 12 : index
    %107 = memref.load %arg2[%c12] : memref<20xf32, #tpu.memory_space<smem>>
    %108 = vector.broadcast %107 : f32 to vector<2x6xf32>
    %109 = arith.mulf %108, %18 : vector<2x6xf32>
    %110 = vector.broadcast %107 : f32 to vector<2x6xf32>
    %111 = arith.mulf %110, %24 : vector<2x6xf32>
    %c13 = arith.constant 13 : index
    %112 = memref.load %arg2[%c13] : memref<20xf32, #tpu.memory_space<smem>>
    %113 = vector.broadcast %112 : f32 to vector<2x6xf32>
    %114 = arith.mulf %113, %24 : vector<2x6xf32>
    %115 = vector.broadcast %112 : f32 to vector<2x6xf32>
    %116 = arith.mulf %115, %30 : vector<2x6xf32>
    %c14 = arith.constant 14 : index
    %117 = memref.load %arg2[%c14] : memref<20xf32, #tpu.memory_space<smem>>
    %118 = vector.broadcast %117 : f32 to vector<2x6xf32>
    %119 = arith.mulf %118, %30 : vector<2x6xf32>
    %120 = vector.broadcast %117 : f32 to vector<2x6xf32>
    %121 = arith.mulf %120, %36 : vector<2x6xf32>
    %c15 = arith.constant 15 : index
    %122 = memref.load %arg2[%c15] : memref<20xf32, #tpu.memory_space<smem>>
    %123 = vector.broadcast %122 : f32 to vector<2x6xf32>
    %124 = arith.mulf %123, %40 : vector<2x6xf32>
    %125 = vector.broadcast %122 : f32 to vector<2x6xf32>
    %126 = arith.mulf %125, %43 : vector<2x6xf32>
    %c16 = arith.constant 16 : index
    %127 = memref.load %arg2[%c16] : memref<20xf32, #tpu.memory_space<smem>>
    %128 = vector.broadcast %127 : f32 to vector<2x6xf32>
    %129 = arith.mulf %128, %43 : vector<2x6xf32>
    %130 = vector.broadcast %127 : f32 to vector<2x6xf32>
    %131 = arith.mulf %130, %49 : vector<2x6xf32>
    %c17 = arith.constant 17 : index
    %132 = memref.load %arg2[%c17] : memref<20xf32, #tpu.memory_space<smem>>
    %133 = vector.broadcast %132 : f32 to vector<2x6xf32>
    %134 = arith.mulf %133, %49 : vector<2x6xf32>
    %135 = vector.broadcast %132 : f32 to vector<2x6xf32>
    %136 = arith.mulf %135, %55 : vector<2x6xf32>
    %c18 = arith.constant 18 : index
    %137 = memref.load %arg2[%c18] : memref<20xf32, #tpu.memory_space<smem>>
    %138 = vector.broadcast %137 : f32 to vector<2x6xf32>
    %139 = arith.mulf %138, %55 : vector<2x6xf32>
    %140 = vector.broadcast %137 : f32 to vector<2x6xf32>
    %141 = arith.mulf %140, %61 : vector<2x6xf32>
    %c19 = arith.constant 19 : index
    %142 = memref.load %arg2[%c19] : memref<20xf32, #tpu.memory_space<smem>>
    %143 = vector.broadcast %142 : f32 to vector<2x6xf32>
    %144 = arith.mulf %143, %61 : vector<2x6xf32>
    %145 = vector.broadcast %142 : f32 to vector<2x6xf32>
    %146 = arith.mulf %145, %67 : vector<2x6xf32>
    %147 = arith.addf %99, %104 : vector<2x6xf32>
    %148 = arith.addf %109, %114 : vector<2x6xf32>
    %149 = arith.addf %119, %124 : vector<2x6xf32>
    %150 = arith.addf %129, %134 : vector<2x6xf32>
    %151 = arith.addf %139, %144 : vector<2x6xf32>
    %152 = arith.addf %147, %148 : vector<2x6xf32>
    %153 = arith.addf %149, %150 : vector<2x6xf32>
    %154 = arith.addf %152, %153 : vector<2x6xf32>
    %155 = arith.addf %154, %151 : vector<2x6xf32>
    %156 = arith.addf %101, %106 : vector<2x6xf32>
    %157 = arith.addf %111, %116 : vector<2x6xf32>
    %158 = arith.addf %121, %126 : vector<2x6xf32>
    %159 = arith.addf %131, %136 : vector<2x6xf32>
    %160 = arith.addf %141, %146 : vector<2x6xf32>
    %161 = arith.addf %156, %157 : vector<2x6xf32>
    %162 = arith.addf %158, %159 : vector<2x6xf32>
    %163 = arith.addf %161, %162 : vector<2x6xf32>
    %164 = arith.addf %163, %160 : vector<2x6xf32>
    %165 = arith.maximumf %155, %164 : vector<2x6xf32>
    %c1_20 = arith.constant 1 : index
    %166 = memref.load %arg3[%c1_20] : memref<2xf32, #tpu.memory_space<smem>>
    %167 = vector.broadcast %166 : f32 to vector<2x6xf32>
    %168 = arith.addf %165, %167 : vector<2x6xf32>
    %cst_21 = arith.constant 0.000000e+00 : f32
    %169 = vector.broadcast %cst_21 : f32 to vector<2x6xf32>
    %170 = arith.maximumf %168, %169 : vector<2x6xf32>
    %c0_22 = arith.constant 0 : index
    %c1_23 = arith.constant 1 : index
    %c0_24 = arith.constant 0 : index
    %171 = vector.load %arg4[%c0_22, %c1_23, %c0_24] : memref<2x2x6xf32, #tpu.memory_space<vmem>>, vector<2x1x6xf32>
    %172 = vector.shape_cast %171 : vector<2x1x6xf32> to vector<2x6xf32>
    %173 = vector.shape_cast %170 : vector<2x6xf32> to vector<2x1x6xf32>
    tpu.vector_store %arg4[%c0_22, %c1_23, %c0_24], %173 {strides = array<i32>} : memref<2x2x6xf32, #tpu.memory_space<vmem>>, vector<2x1x6xf32>,
    return
  }
  func.func @transform_0(%arg0: i32) -> (i32, i32, i32, i32) {
    %c0_i32 = arith.constant 0 : i32
    %c0_i32_0 = arith.constant 0 : i32
    %c0_i32_1 = arith.constant 0 : i32
    %c0_i32_2 = arith.constant 0 : i32
    return %c0_i32, %c0_i32_0, %arg0, %c0_i32_1 : i32, i32, i32, i32
  }
  func.func @transform_1(%arg0: i32) -> i32 {
    %c0_i32 = arith.constant 0 : i32
    %c0_i32_0 = arith.constant 0 : i32
    return %c0_i32 : i32
  }
  func.func @transform_2(%arg0: i32) -> i32 {
    %c0_i32 = arith.constant 0 : i32
    %c0_i32_0 = arith.constant 0 : i32
    return %c0_i32 : i32
  }
  func.func @transform_3(%arg0: i32) -> (i32, i32, i32) {
    %c0_i32 = arith.constant 0 : i32
    %c0_i32_0 = arith.constant 0 : i32
    %c0_i32_1 = arith.constant 0 : i32
    return %arg0, %c0_i32, %c0_i32_0 : i32, i32, i32
  }
}

</mosaic_0001>

<bundles_post_ra>
// kernel: tpu_custom_call.1
= control target key start
LH: loop header
LB: loop body
LE: loop exit
PB: predicated region body
PF: predicated region fallthrough
CT: control target
= control target key end

     0   :  { %8 = vsyncpa [#allocation3], 0  ;;  %s670_s0 = inlined_call_operand.hbm [shape: f32[2,2,2,8], index: 0, kind: input, shape index: {}]   ;;  %s671_s1 = inlined_call_operand.vmem [shape: f32[20], index: 1, kind: input, shape index: {}]   ;;  %s672_s2 = inlined_call_operand.vmem [shape: f32[2], index: 2, kind: input, shape index: {}]   ;;  %s673_s3 = inlined_call_operand.hbm [shape: f32[2,2,6], index: 3, kind: output, shape index: {}]  }
   0x1   :  { %9 = vsyncpa [#allocation5], 0 }
   0x2   :  { %10 = vsyncpa [#allocation8], 0 }
   0x3   :  { %11 = vsyncpa [#allocation4], 0  ;;  %s475_s12 = smov [#allocation2]   ;;  %s30_s16 = sshll.u32 %s671_s1, 4  ;;  %s31_s16 = int_to_ptr.vmem [resolvable:$true] %s30_s16 }
   0x4   :  { %s17_s13 = sshll.u32 %s475_s12, 4  ;;  %s18_s13 = int_to_ptr.vmem [resolvable:$true] %s17_s13 }
   0x5   :  { %s411_s17 = scalar_lea.vmem %s18_s13, 128  ;;  %p416_p1 = scmp.lt.s32.totalorder %s18_s13, %s18_s13 }
   0x6   :  { %p412_p0 = scmp.ne.s32.totalorder %s18_s13, %s411_s17  ;;  %p417_p2 = scmp.lt.s32.totalorder %s411_s17, %s411_s17 }
   0x8   :  { %p418_p3 = por %p417_p2, %p416_p1 }
   0xa   :  { %p419_p4 = pnand %p418_p3, %p412_p0 }
   0xc   :  { %422 = shalt.err (!%p419_p4)
}
   0xd   :  { %s476_s18 = smov 32   ;;  %s477_s19 = smov 2  }
   0xe   :  { %23 = dma.hbm_to_vmem [thread:$0]  %s670_s0, 128, %s18_s13, [#allocation3], %s476_s18, %s476_s18, %s477_s19  }
   0xf   :  { %s423_s22 = scalar_lea.vmem %s31_s16, 16  ;;  %p428_p6 = scmp.lt.s32.totalorder %s31_s16, %s31_s16 }
  0x10   :  { %p424_p5 = scmp.ne.s32.totalorder %s31_s16, %s423_s22  ;;  %p429_p7 = scmp.lt.s32.totalorder %s423_s22, %s423_s22 }
  0x12   :  { %p430_p8 = por %p429_p7, %p428_p6 }
  0x14   :  { %p431_p9 = pnand %p430_p8, %p424_p5 }
  0x16   :  { %434 = shalt.err (!%p431_p9)
}
  0x17   :  { %s478_s1 = smov [#allocation6]   ;;  %s40_s25 = sshll.u32 %s672_s2, 4  ;;  %s41_s25 = int_to_ptr.vmem [resolvable:$true] %s40_s25 }
  0x18   :  { %33 = dma.vmem_to_smem %s31_s16, 16, %s478_s1, [#allocation5]  }
  0x19   :  { %s435_s26 = scalar_lea.vmem %s41_s25, 16  ;;  %p440_p11 = scmp.lt.s32.totalorder %s41_s25, %s41_s25 }
  0x1a   :  { %p436_p10 = scmp.ne.s32.totalorder %s41_s25, %s435_s26  ;;  %p441_p12 = scmp.lt.s32.totalorder %s435_s26, %s435_s26 }
  0x1c   :  { %p442_p13 = por %p441_p12, %p440_p11 }
  0x1e   :  { %p443_p0 = pnand %p442_p13, %p436_p10 }
  0x20   :  { %446 = shalt.err (!%p443_p0)
}
  0x21   :  { %s479_s0 = smov [#allocation7]  }
  0x22   :  { %43 = dma.vmem_to_smem %s41_s25, 16, %s479_s0, [#allocation8]  }
  0x23   :  { %467 = dma.done.wait [#allocation3], 128  }
  0x24   :  { %468 = vsyncadd [#allocation3], 4294967168 }
  0x25   :  { %469 = dma.done.wait [#allocation5], 16  }
  0x26   :  { %470 = vsyncadd [#allocation5], 4294967280 }
  0x27   :  { %471 = dma.done.wait [#allocation8], 16  }
  0x28   :  { %472 = vsyncadd [#allocation8], 4294967280 }
  0x29   :  { %53 = sfence }
  0x2a   :  { %s517_s27 = sld [smem:[#allocation6 + $0x7]]  ;;  %v523_v0 = vld [vmem:[#allocation2 + $0x2] sm:$0x3]  ;;  %v530_v5 = vld [vmem:[#allocation2] sm:$0x3]  ;;  %s480_s6 = smov 127  }
  0x2b   :  { %s519_s2 = sld [smem:[#allocation6 + $0x11]]  ;;  %v538_v9 = vld [vmem:[#allocation2 + $0x6] sm:$0x3]  ;;  %s481_s12 = smov 1   ;;  %v598_v38 = vld [vmem:[#allocation2 + $0x4] sm:$0x3] }
  0x2c   :  { %s377_s28 = sld [smem:[#allocation6 + $0x5]]  ;;  %s482_s13 = smov 126   ;;  %vm205_vm0 = vcmask 40960  }
  0x2d   :  { %s521_s29 = sld [smem:[#allocation6 + $0x3]]  ;;  %s484_s25 = smov [#allocation9]  }
  0x2e   :  { %s387_s30 = sld [smem:[#allocation6 + $0xf]]  ;;  %s359_s26 = sshll.u32 %s484_s25, 4  ;;  %s360_s26 = int_to_ptr.vmem [resolvable:$true] %s359_s26 }
  0x2f   :  { %s526_s4 = sld [smem:[#allocation6 + $0xd]]  ;;  %s447_s0 = scalar_lea.vmem %s360_s26, 64 }
  0x30   :  { %v90_v1 = vstv %s517_s27  ;;  %s532_s5 = sld [smem:[#allocation6 + $0x6]]  ;;  %p448_p1 = scmp.ne.s32.totalorder %s360_s26, %s447_s0 }
  0x31   :  { %v91_v2 = vmul.f32 %v90_v1, %v523_v0  ;;  %v237_v3 = vstv %s519_s2  ;;  %s544_s7 = sld [smem:[#allocation6 + $0x10]]  ;;  %v92_v17 = vmul.f32 %v90_v1, %v538_v9  ;;  %p452_p2 = scmp.lt.s32.totalorder %s360_s26, %s360_s26 }
  0x32   :  { %v82_v4 = vstv %s377_s28  ;;  %v238_v6 = vmul.f32 %v237_v3, %v523_v0  ;;  %s561_s8 = sld [smem:[#allocation6 + $0x13]]  ;;  %v239_v23 = vmul.f32 %v237_v3, %v538_v9  ;;  %p453_p3 = scmp.lt.s32.totalorder %s447_s0, %s447_s0 }
  0x33   :  { %109 = vrot.lane.b32.xlu0 %v91_v2, %s480_s6  ;;  %v83_v7 = vmul.f32 %v82_v4, %v523_v0  ;;  %v74_v8 = vstv %s521_s29  ;;  %v84_v12 = vmul.f32 %v82_v4, %v538_v9  ;;  %s567_s9 = sld [smem:[#allocation6 + $0xb]] }
  0x34   :  { %v76_v10 = vmul.f32 %v74_v8, %v530_v5  ;;  %v229_v11 = vstv %s387_s30  ;;  %s569_s10 = sld [smem:[#allocation6 + $0x8]]  ;;  %v75_v61 = vmul.f32 %v74_v8, %v598_v38  ;;  %p454_p4 = por %p453_p3, %p452_p2 }
  0x35   :  { %104 = vrot.lane.b32.xlu1 %v83_v7, %s477_s19  ;;  %v221_v13 = vstv %s526_s4  ;;  %v230_v14 = vmul.f32 %v229_v11, %v523_v0  ;;  %v231_v18 = vmul.f32 %v229_v11, %v538_v9  ;;  %s571_s11 = sld [smem:[#allocation6 + $0x9]] }
  0x36   :  { %v86_v15 = vstv %s532_s5  ;;  %v223_v16 = vmul.f32 %v221_v13, %v530_v5  ;;  %s376_s14 = sld [smem:[#allocation6 + $0x4]]  ;;  %v222_v7 = vmul.f32 %v221_v13, %v598_v38  ;;  %p455_p5 = pnand %p454_p4, %p448_p1 }
  0x37   :  { %256 = vrot.lane.b32.xlu0 %v238_v6, %s480_s6  ;;  %v88_v19 = vmul.f32 %v86_v15, %v523_v0  ;;  %v233_v20 = vstv %s544_s7  ;;  %s590_s15 = sld [smem:[#allocation6 + $0x2]]  ;;  %v87_v34 = vmul.f32 %v86_v15, %v538_v9 }
  0x38   :  { %v235_v22 = vmul.f32 %v233_v20, %v523_v0  ;;  %v245_v25 = vstv %s561_s8  ;;  %s593_s16 = sld [smem:[#allocation6 + $0xe]]  ;;  %v234_v41 = vmul.f32 %v233_v20, %v538_v9 }
  0x39   :  { %144 = vrot.lane.b32.xlu1 %v76_v10, %s480_s6  ;;  %v153_v21 = vadd.f32 %v92_v17, %v88_v19  ;;  %v246_v26 = vmul.f32 %v245_v25, %v523_v0  ;;  %v213_v27 = vstv %s567_s9  ;;  %s595_s17 = sld [smem:[#allocation6 + $0xc]] }
  0x3a   :  { %v300_v24 = vadd.f32 %v239_v23, %v235_v22  ;;  %v94_v28 = vstv %s569_s10  ;;  %v215_v30 = vmul.f32 %v213_v27, %v530_v5  ;;  %s601_s20 = sld [smem:[#allocation6 + $0x1]] }
  0x3b   :  { %149 = vrot.lane.b32.xlu0 %v84_v12, %s477_s19  ;;  %v98_v29 = vstv %s571_s11  ;;  %v96_v31 = vmul.f32 %v94_v28, %v523_v0  ;;  %s615_s21 = sld [smem:[#allocation6 + $0x12]] }
  0x3c   :  { %v100_v32 = vmul.f32 %v98_v29, %v538_v9  ;;  %v78_v35 = vstv %s376_s14  ;;  %v99_v50 = vmul.f32 %v98_v29, %v523_v0  ;;  %s61_s22 = sld [smem:[#allocation6]] }
  0x3d   :  { %251 = vrot.lane.b32.xlu1 %v230_v14, %s477_s19  ;;  %v79_v36 = vmul.f32 %v78_v35, %v530_v5  ;;  %v70_v39 = vstv %s590_s15  ;;  %v80_v56 = vmul.f32 %v78_v35, %v598_v38  ;;  %s382_s1 = sld [smem:[#allocation6 + $0xa]] }
  0x3e   :  { %v154_v33 = vadd.f32 %v100_v32, %v96_v31  ;;  %v72_v44 = vmul.f32 %v70_v39, %v598_v38  ;;  %v225_v48 = vstv %s593_s16  ;;  %v71_v58 = vmul.f32 %v70_v39, %v530_v5  ;;  %s176_s23 = sld [smem:[#allocation7]] }
  0x3f   :  { %291 = vrot.lane.b32.xlu0 %v223_v16, %s480_s6  ;;  %v217_v49 = vstv %s595_s17  ;;  %v226_v52 = vmul.f32 %v225_v48, %v530_v5  ;;  %v227_v2 = vmul.f32 %v225_v48, %v598_v38  ;;  %v247_v16 = vmul.f32 %v245_v25, %v538_v9  ;;  %s392_s24 = sld [smem:[#allocation7 + $0x1]] }
  0x40   :  { %v66_v54 = vstv %s601_s20  ;;  %v219_v55 = vmul.f32 %v217_v49, %v598_v38  ;;  %v218_v1 = vmul.f32 %v217_v49, %v530_v5  ;;  %v102_v6 = vadd.f32 %v75_v61, %v71_v58 }
  0x41   :  { %296 = vrot.lane.b32.xlu1 %v231_v18, %s477_s19  ;;  %v68_v60 = vmul.f32 %v66_v54, %v530_v5  ;;  %v241_v11 = vstv %s615_s21  ;;  %v214_v49 = vmul.f32 %v213_v27, %v598_v38 }
  0x42   :  { %v249_v14 = vadd.f32 %v222_v7, %v218_v1  ;;  %v243_v15 = vmul.f32 %v241_v11, %v523_v0 }
  0x44   :  { %v301_v13 = vadd.f32 %v247_v16, %v243_v15  ;;  %v177_v1 = vstv %s176_s23 }
  0x45   :  { %161 = vrot.lane.b32.xlu1 %v153_v21, %s481_s12  ;;  %v95_v21 = vmul.f32 %v94_v28, %v538_v9 }
  0x49   :  { %308 = vrot.lane.b32.xlu1 %v300_v24, %s481_s12  ;;  %v242_v24 = vmul.f32 %v241_v11, %v538_v9 }
  0x4d   :  { %261 = vrot.lane.b32.xlu1 %v246_v26, %s480_s6 }
  0x51   :  { %286 = vrot.lane.b32.xlu1 %v215_v30, %s480_s6 }
  0x55   :  { %171 = vrot.lane.b32.xlu1 %v154_v33, %s482_s13  ;;  %v62_v33 = vstv %s61_s22 }
  0x56   :  { %v64_v35 = vmul.f32 %v62_v33, %v598_v38 }
  0xa5   :  { %v110_v37 = vpop.permute.xlu0 %109 }
  0xa6   :  { %v112_v40 = vadd.f32 %v110_v37, %v87_v34 }
  0xa7   :  { %v105_v42 = vpop.permute.xlu1 %104 }
  0xa8   :  { %124 = vrot.lane.b32.xlu0 %v112_v40, %s477_s19  ;;  %v107_v43 = vadd.f32 %v105_v42, %v79_v36  ;;  %v209_v36 = vstv %s382_s1  ;;  %v67_v40 = vmul.f32 %v66_v54, %v598_v38  ;;  %v184_v54 = vlaneseq }
  0xa9   :  { %v257_v45 = vpop.permute.xlu0 %256  ;;  %v211_v42 = vmul.f32 %v209_v36, %v598_v38  ;;  %v210_v48 = vmul.f32 %v209_v36, %v530_v5 }
  0xaa   :  { %v259_v46 = vadd.f32 %v257_v45, %v234_v41  ;;  %v63_v41 = vmul.f32 %v62_v33, %v530_v5 }
  0xab   :  { %v145_v47 = vpop.permute.xlu1 %144  ;;  %v248_v58 = vadd.f32 %v214_v49, %v210_v48 }
  0xac   :  { %271 = vrot.lane.b32.xlu0 %v259_v46, %s477_s19  ;;  %v147_v51 = vadd.f32 %v145_v47, %v72_v44  ;;  %v101_v45 = vadd.f32 %v67_v40, %v63_v41 }
  0xad   :  { %v150_v53 = vpop.permute.xlu0 %149 }
  0xae   :  { %156 = vrot.lane.b32.xlu1 %v147_v51, %s480_s6  ;;  %v152_v4 = vadd.f32 %v150_v53, %v80_v56 }
  0xaf   :  { %v252_v57 = vpop.permute.xlu1 %251 }
  0xb0   :  { %114 = vrot.lane.b32.xlu0 %v99_v50, %s480_s6  ;;  %v254_v59 = vadd.f32 %v252_v57, %v226_v52  ;;  %v483_v52 = vmov 1966171168  }
  0xb1   :  { %v292_v62 = vpop.permute.xlu0 %291  ;;  %v182_v53 = vunpack.c.l.s4 %v483_v52 }
  0xb2   :  { %v294_v63 = vadd.f32 %v292_v62, %v219_v55  ;;  %v185_v62 = vshrl.u32 %v184_v54, 7 }
  0xb3   :  { %v297_v3 = vpop.permute.xlu1 %296  ;;  %v183_v61 = vunpack.c.0.s8 %v182_v53 }
  0xb4   :  { %303 = vrot.lane.b32.xlu1 %v294_v63, %s480_s6  ;;  %139 = vrot.lane.b32.xlu0 %v68_v60, %s480_s6  ;;  %v299_v8 = vadd.f32 %v297_v3, %v227_v2 }
  0xb7   :  { %v162_v10 = vpop.permute.xlu1 %161 }
  0xb8   :  { %v164_v12 = vadd.f32 %v162_v10, %v152_v4  ;;  %119 = vrot.lane.b32.xlu0 %v102_v6, %s480_s6  ;;  %v186_v4 = vsub.s32 %v183_v61, %v185_v62 }
  0xba   :  { %166 = vrot.lane.b32.xlu1 %v164_v12, %s482_s13 }
  0xbb   :  { %v309_v17 = vpop.permute.xlu1 %308 }
  0xbc   :  { %v311_v18 = vadd.f32 %v309_v17, %v299_v8  ;;  %266 = vrot.lane.b32.xlu0 %v249_v14, %s480_s6  ;;  %v324_v14 = vstv %s392_s24 }
  0xbe   :  { %313 = vrot.lane.b32.xlu1 %v311_v18, %s482_s13 }
  0xbf   :  { %v262_v25 = vpop.permute.xlu1 %261 }
  0xc0   :  { %v264_v29 = vadd.f32 %v262_v25, %v242_v24 }
  0xc2   :  { %318 = vrot.lane.b32.xlu1 %v301_v13, %s482_s13 }
  0xc3   :  { %v287_v30 = vpop.permute.xlu1 %286 }
  0xc4   :  { %v289_v47 = vadd.f32 %v287_v30, %v211_v42 }
  0xc7   :  { %v172_v31 = vpop.permute.xlu1 %171 }
 0x11a   :  { %v125_v19 = vpop.permute.xlu0 %124 }
 0x11b   :  { %v127_v0 = vadd.f32 %v125_v19, %v107_v43 }
 0x11e   :  { %v272_v20 = vpop.permute.xlu0 %271 }
 0x11f   :  { %v274_v26 = vadd.f32 %v272_v20, %v254_v59 }
 0x120   :  { %v157_v32 = vpop.permute.xlu1 %156 }
 0x122   :  { %v115_v22 = vpop.permute.xlu0 %114 }
 0x123   :  { %v117_v23 = vadd.f32 %v115_v22, %v95_v21 }
 0x125   :  { %134 = vrot.lane.b32.xlu0 %v117_v23, %s480_s6 }
 0x126   :  { %v140_v28 = vpop.permute.xlu0 %139  ;;  %v304_v9 = vpop.permute.xlu1 %303 }
 0x127   :  { %v142_v39 = vadd.f32 %v140_v28, %v64_v35  ;;  %v306_v57 = vadd.f32 %v304_v9, %v289_v47 }
 0x129   :  { %129 = vrot.lane.b32.xlu0 %v127_v0, %s482_s13  ;;  %v159_v44 = vadd.f32 %v157_v32, %v142_v39 }
 0x12a   :  { %v120_v34 = vpop.permute.xlu0 %119 }
 0x12b   :  { %v122_v51 = vadd.f32 %v120_v34, %v101_v45 }
 0x12c   :  { %v167_v43 = vpop.permute.xlu1 %166 }
 0x12d   :  { %276 = vrot.lane.b32.xlu0 %v274_v26, %s482_s13  ;;  %v169_v50 = vadd.f32 %v167_v43, %v159_v44 }
 0x12e   :  { %v267_v37 = vpop.permute.xlu0 %266 }
 0x12f   :  { %v174_v60 = vadd.f32 %v172_v31, %v169_v50  ;;  %v269_v3 = vadd.f32 %v267_v37, %v248_v58 }
 0x130   :  { %v314_v55 = vpop.permute.xlu1 %313 }
 0x131   :  { %281 = vrot.lane.b32.xlu0 %v264_v29, %s480_s6  ;;  %v316_v2 = vadd.f32 %v314_v55, %v306_v57 }
 0x134   :  { %v319_v38 = vpop.permute.xlu1 %318 }
 0x135   :  { %v321_v11 = vadd.f32 %v319_v38, %v316_v2 }
 0x197   :  { %v135_v46 = vpop.permute.xlu0 %134 }
 0x19b   :  { %v130_v56 = vpop.permute.xlu0 %129 }
 0x19c   :  { %v132_v59 = vadd.f32 %v130_v56, %v122_v51 }
 0x19e   :  { %v137_v63 = vadd.f32 %v135_v46, %v132_v59 }
 0x19f   :  { %v277_v5 = vpop.permute.xlu0 %276 }
 0x1a0   :  { %v175_v27 = vmax.f32 %v137_v63, %v174_v60  ;;  %v279_v7 = vadd.f32 %v277_v5, %v269_v3 }
 0x1a2   :  { %v178_v6 = vadd.f32 %v177_v1, %v175_v27 }
 0x1a3   :  { %v282_v10 = vpop.permute.xlu0 %281 }
 0x1a4   :  { %v179_v8 = vmax.f32 %v178_v6, 0.0  ;;  %v284_v12 = vadd.f32 %v282_v10, %v279_v7 }
 0x1a6   :  { %v187_v15 = vrot.slane %v179_v8, %v186_v4  ;;  %v322_v16 = vmax.f32 %v284_v12, %v321_v11 }
 0x1a8   :  { %v325_v17 = vadd.f32 %v324_v14, %v322_v16  ;;  %v188_v18 = vcombine.high %v187_v15, %v187_v15  ;;  %v195_v13 = vrot.slane %v187_v15, %v186_v4 }
 0x1aa   :  { %v326_v19 = vmax.f32 %v325_v17, 0.0  ;;  %v202_v20 = vrot.slane %v188_v18, %v186_v4  ;;  %206 = vst.msk [vmem:[#allocation9] sm:$0x1] %vm205_vm0, %v195_v13 }
 0x1ac   :  { %v334_v21 = vrot.slane %v326_v19, %v186_v4  ;;  %207 = vst.msk [vmem:[#allocation9 + $0x2] sm:$0x1] %vm205_vm0, %v202_v20 }
 0x1ae   :  { %v335_v22 = vcombine.high %v334_v21, %v334_v21  ;;  %v342_v23 = vrot.slane %v334_v21, %v186_v4 }
 0x1b0   :  { %v349_v0 = vrot.slane %v335_v22, %v186_v4  ;;  %352 = vst.msk [vmem:[#allocation9 + $0x1] sm:$0x1] %vm205_vm0, %v342_v23 }
 0x1b2   :  { %353 = vst.msk [vmem:[#allocation9 + $0x3] sm:$0x1] %vm205_vm0, %v349_v0 }
 0x1b3   :  { %458 = shalt.err (!%p455_p5)
}
 0x1b4   :  { %365 = dma.vmem_to_hbm [thread:$0]  %s360_s26, 64, %s673_s3, [#allocation4], %s476_s18, %s476_s18, %s477_s19  }
 0x1b5   :  { %473 = dma.done.wait [#allocation4], 64  }
 0x1b6   :  { %474 = vsyncadd [#allocation4], 4294967232 }
 0x1b7   :  { %369 = vsyncpa [#allocation3], 1 }
 0x1b8   :  { %370 = vsyncpa [#allocation4], 1 }
 0x1b9   :  { %371 = vsyncpa [#allocation5], 1 }
 0x1ba   :  { %372 = vsyncpa [#allocation8], 1 }

</bundles_post_ra>
